<compile_context>
chip_gen: v6e
topology: v6e:2x2x1
jax: 0.10.0
libtpu: 0.0.40
codegen_flags: <defaults>
</compile_context>

<pallas_src>
import functools

import jax
import jax.numpy as jnp
from jax import lax
from jax.experimental import pallas as pl
from jax.experimental.pallas import tpu as pltpu

LANE = 128                 # lanes per sublane row (sample axis packed 2-D)
MAX_ROWS_PER_BLOCK = 64    # 64 rows * 128 lanes = 8192 samples per grid step


def _ceil_to(v, q):
    return ((v + q - 1) // q) * q


# ---------------------------------------------------------------------------
# phi relevance (plain JAX) — used only by the pure-JAX reference below.
# Monotone piecewise cubic Hermite interpolation over control points
# (x_k, phi_k, m_k); clamped to the boundary phi values outside [x_0, x_last].
# TODO(synk): exact extrapolation behaviour of the closed-source phi C library
#             outside the control-point range is not reproduced bit-for-bit;
#             control-point x values must be strictly increasing (as in the
#             original phi_range validation).
# ---------------------------------------------------------------------------
def phi_relevance(y, control_pts):
    cp = jnp.asarray(control_pts, dtype=jnp.float32)     # (npts, 3): x, phi, m
    x, f, m = cp[:, 0], cp[:, 1], cp[:, 2]
    k = jnp.clip(jnp.searchsorted(x, y, side="right") - 1, 0, x.shape[0] - 2)
    x0, x1 = x[k], x[k + 1]
    f0, f1 = f[k], f[k + 1]
    m0, m1 = m[k], m[k + 1]
    h = x1 - x0
    s = (y - x0) / h
    s2, s3 = s * s, s * s * s
    val = ((2.0 * s3 - 3.0 * s2 + 1.0) * f0
           + (s3 - 2.0 * s2 + s) * h * m0
           + (-2.0 * s3 + 3.0 * s2) * f1
           + (s3 - s2) * h * m1)
    val = jnp.where(y <= x[0], f[0], jnp.where(y >= x[-1], f[-1], val))
    return jnp.clip(val, 0.0, 1.0)


# ---------------------------------------------------------------------------
# Pallas kernel: one (rows_per_block, 128) sample block per grid step.
#   tab_ref : (npts, 8) f32 in SMEM
#             row j < npts-1: [x_j, 1/h_j, f_j, h_j*m_j, f_{j+1}, h_j*m_{j+1}, 0, 0]
#             row npts-1    : [x_last, 0, f_last, 0, 0, 0, 0, 0]
#   y_ref   : (rpb, 128) f32 true targets   (padding = 0)
#   yh_ref  : (rpb, 128) f32 predictions    (padding = 0  -> sq contribution 0)
#   out_ref : (1, 128)  f32 per-block partial (lane 0 holds the value)
# ---------------------------------------------------------------------------
def _sera_kernel(tab_ref, y_ref, yh_ref, out_ref, *, npts, resolution):
    y = y_ref[...]
    yh = yh_ref[...]

    # --- phi(y): piecewise cubic Hermite over the SMEM control-point table ---
    # Segment index = number of interior knots x_j (1 <= j <= npts-2) with y >= x_j.
    kseg = jnp.zeros(y.shape, jnp.int32)
    for j in range(1, npts - 1):
        kseg = kseg + (y >= tab_ref[j, 0]).astype(jnp.int32)

    val = jnp.zeros(y.shape, jnp.float32)
    for j in range(npts - 1):
        x0 = tab_ref[j, 0]
        inv_h = tab_ref[j, 1]
        f0 = tab_ref[j, 2]
        c0 = tab_ref[j, 3]      # h_j * m_j
        f1 = tab_ref[j, 4]
        c1 = tab_ref[j, 5]      # h_j * m_{j+1}
        s = (y - x0) * inv_h
        s2 = s * s
        s3 = s2 * s
        hv = ((2.0 * s3 - 3.0 * s2 + 1.0) * f0
              + (s3 - 2.0 * s2 + s) * c0
              + (3.0 * s2 - 2.0 * s3) * f1
              + (s3 - s2) * c1)
        val = hv if j == 0 else jnp.where(kseg == j, hv, val)

    x_lo = tab_ref[0, 0]
    f_lo = tab_ref[0, 2]
    x_hi = tab_ref[npts - 1, 0]
    f_hi = tab_ref[npts - 1, 2]
    val = jnp.where(y <= x_lo, f_lo, jnp.where(y >= x_hi, f_hi, val))
    ph = jnp.clip(val, 0.0, 1.0)

    # --- closed-form trapezoid weight: sum_k w_k * 1[phi >= k*dt] ---
    dt = 1.0 / float(resolution - 1)
    m = jnp.floor(ph * float(resolution - 1))
    w = jnp.minimum(dt * (m + 0.5), 1.0)

    # --- squared error, weighted sum over the block ---
    sq = (yh - y) * (yh - y)
    part = jnp.sum(sq * w, axis=1, keepdims=True)   # (rpb, 1) lane reduce (XLU)
    part = jnp.sum(part, axis=0, keepdims=True)     # (1, 1)   sublane reduce

    # Single lane-dense store per grid step: partial in lane 0, zeros elsewhere.
    lane = lax.broadcasted_iota(jnp.int32, (1, LANE), 1)
    out_ref[...] = jnp.where(lane == 0, part, 0.0)


@functools.partial(jax.jit, static_argnames=("resolution",))
def sera_criterion(y_hat, y, control_pts, resolution=1000):
    """Pallas implementation of SeraCriterion.forward(y_hat, y) -> scalar."""
    if resolution < 2:
        raise ValueError("resolution must be >= 2 (trapezoid needs >= 2 points)")

    # Derived control-point table (npts, 8) for the SMEM-resident phi eval.
    cp = jnp.asarray(control_pts, dtype=jnp.float32)     # (npts, 3): x, phi, m
    npts = cp.shape[0]
    x, f, mm = cp[:, 0], cp[:, 1], cp[:, 2]
    h = x[1:] - x[:-1]
    inv_h = 1.0 / h
    tab = jnp.zeros((npts, 8), jnp.float32)
    tab = tab.at[:, 0].set(x)
    tab = tab.at[:, 2].set(f)
    tab = tab.at[: npts - 1, 1].set(inv_h)
    tab = tab.at[: npts - 1, 3].set(h * mm[:-1])
    tab = tab.at[: npts - 1, 4].set(f[1:])
    tab = tab.at[: npts - 1, 5].set(h * mm[1:])

    y_flat = jnp.reshape(y, (-1,)).astype(jnp.float32)
    yh_flat = jnp.reshape(y_hat, (-1,)).astype(jnp.float32)
    n = y_flat.shape[0]

    # Sublane-dense (rows, 128) layout; blocks of <= 64 rows (8192 samples),
    # >= 2 "parallel" blocks whenever rows > 8 so both v7x TCs get work.
    rows = _ceil_to(max(pl.cdiv(n, LANE), 1), 8)
    if rows <= 8:
        rpb = rows
    else:
        rpb = min(MAX_ROWS_PER_BLOCK, max(8, ((rows // 2) // 8) * 8))
    rows = _ceil_to(rows, rpb)
    num_blocks = rows // rpb
    n_pad = rows * LANE

    # Pad y and y_hat identically with zeros -> padded sq error is exactly 0.
    y_p = jnp.pad(y_flat, (0, n_pad - n)).reshape(rows, LANE)
    yh_p = jnp.pad(yh_flat, (0, n_pad - n)).reshape(rows, LANE)

    kernel = functools.partial(_sera_kernel, npts=npts, resolution=resolution)

    out = pl.pallas_call(
        kernel,
        out_shape=jax.ShapeDtypeStruct((num_blocks, LANE), jnp.float32),
        grid_spec=pltpu.PrefetchScalarGridSpec(
            num_scalar_prefetch=0,
            grid=(num_blocks,),
            in_specs=[
                pl.BlockSpec(memory_space=pltpu.MemorySpace.SMEM),   # control table
                pl.BlockSpec((rpb, LANE), lambda i: (i, 0)),         # y
                pl.BlockSpec((rpb, LANE), lambda i: (i, 0)),         # y_hat
            ],
            out_specs=pl.BlockSpec((1, LANE), lambda i: (i, 0)),     # partials
        ),
        compiler_params=pltpu.CompilerParams(
            dimension_semantics=("parallel",),   # independent sample blocks
        ),
    )(tab, y_p, yh_p)

    return jnp.sum(out)


# Pure-JAX reference for a sanity check (mirrors sera_pt / torch.trapezoid).
def sera_reference(y_hat, y, control_pts, resolution=1000):
    y_f = jnp.reshape(y, (-1,)).astype(jnp.float32)
    yh_f = jnp.reshape(y_hat, (-1,)).astype(jnp.float32)
    ph = phi_relevance(y_f, control_pts)
    ts = jnp.linspace(0.0, 1.0, resolution, dtype=jnp.float32)
    sq = (yh_f - y_f) ** 2
    mask = (ph[None, :] >= ts[:, None]).astype(jnp.float32)
    sert = mask @ sq
    return jnp.sum((sert[1:] + sert[:-1]) * jnp.diff(ts)) * 0.5


if __name__ == "__main__":
    # Deterministic "ph" parameters (method='range' control points <x, phi, m>):
    # relevance 1 at extremes (+-2), 0 at the center, zero slopes.
    control_pts = jnp.array(
        [[-2.0, 1.0, 0.0],
         [0.0, 0.0, 0.0],
         [2.0, 1.0, 0.0]], dtype=jnp.float32)
    resolution = 1000

    key = jax.random.PRNGKey(0)
    k1, k2 = jax.random.split(key)
    y = jax.random.normal(k1, (8, 32), dtype=jnp.float32)                # true targets
    y_hat = y + 0.1 * jax.random.normal(k2, (8, 32), dtype=jnp.float32)  # predictions

    loss = sera_criterion(y_hat, y, control_pts, resolution=resolution)
    loss = jax.block_until_ready(loss)

    ref = jax.block_until_ready(sera_reference(y_hat, y, control_pts, resolution))
    assert jnp.isfinite(loss), "SERA loss is not finite"
    assert jnp.abs(loss - ref) <= 1e-3 * (1.0 + jnp.abs(ref)), (loss, ref)

    print("KERNEL_OK")
</pallas_src>

<mosaic_0001>
module attributes {stable_mosaic.version = 11 : i64} {
  func.func @_sera_kernel(%arg0: i32, %arg1: memref<3x8xf32, #tpu.memory_space<smem>>, %arg2: memref<8x128xf32, #tpu.memory_space<vmem>>, %arg3: memref<8x128xf32, #tpu.memory_space<vmem>>, %arg4: memref<1x128xf32, #tpu.memory_space<vmem>>) attributes {dimension_semantics = [#tpu.dimension_semantics<parallel>], iteration_bounds = array<i64: 1>, scalar_prefetch = 0 : i64, scratch_operands = 0 : i64, tpu.core_type = #tpu.core_type<tc>, window_params = [{transform_indices = @transform_0, window_bounds = array<i64: 3, 8>}, {transform_indices = @transform_1, window_bounds = array<i64: 8, 128>}, {transform_indices = @transform_2, window_bounds = array<i64: 8, 128>}, {transform_indices = @transform_3, window_bounds = array<i64: 1, 128>}]} {
    %c0 = arith.constant 0 : index
    %c0_0 = arith.constant 0 : index
    %0 = vector.load %arg2[%c0, %c0_0] : memref<8x128xf32, #tpu.memory_space<vmem>>, vector<8x128xf32>
    %c0_1 = arith.constant 0 : index
    %c0_2 = arith.constant 0 : index
    %1 = vector.load %arg3[%c0_1, %c0_2] : memref<8x128xf32, #tpu.memory_space<vmem>>, vector<8x128xf32>
    %c0_i32 = arith.constant 0 : i32
    %2 = vector.broadcast %c0_i32 : i32 to vector<8x128xi32>
    %c1 = arith.constant 1 : index
    %c0_3 = arith.constant 0 : index
    %3 = memref.load %arg1[%c1, %c0_3] : memref<3x8xf32, #tpu.memory_space<smem>>
    %4 = vector.broadcast %3 : f32 to vector<8x128xf32>
    %5 = arith.cmpf oge, %0, %4 : vector<8x128xf32>
    %6 = arith.extui %5 : vector<8x128xi1> to vector<8x128xi32>
    %7 = arith.addi %2, %6 : vector<8x128xi32>
    %c0_4 = arith.constant 0 : index
    %c0_5 = arith.constant 0 : index
    %8 = memref.load %arg1[%c0_4, %c0_5] : memref<3x8xf32, #tpu.memory_space<smem>>
    %c0_6 = arith.constant 0 : index
    %c1_7 = arith.constant 1 : index
    %9 = memref.load %arg1[%c0_6, %c1_7] : memref<3x8xf32, #tpu.memory_space<smem>>
    %c0_8 = arith.constant 0 : index
    %c2 = arith.constant 2 : index
    %10 = memref.load %arg1[%c0_8, %c2] : memref<3x8xf32, #tpu.memory_space<smem>>
    %c0_9 = arith.constant 0 : index
    %c3 = arith.constant 3 : index
    %11 = memref.load %arg1[%c0_9, %c3] : memref<3x8xf32, #tpu.memory_space<smem>>
    %c0_10 = arith.constant 0 : index
    %c4 = arith.constant 4 : index
    %12 = memref.load %arg1[%c0_10, %c4] : memref<3x8xf32, #tpu.memory_space<smem>>
    %c0_11 = arith.constant 0 : index
    %c5 = arith.constant 5 : index
    %13 = memref.load %arg1[%c0_11, %c5] : memref<3x8xf32, #tpu.memory_space<smem>>
    %14 = vector.broadcast %8 : f32 to vector<8x128xf32>
    %15 = arith.subf %0, %14 : vector<8x128xf32>
    %16 = vector.broadcast %9 : f32 to vector<8x128xf32>
    %17 = arith.mulf %15, %16 : vector<8x128xf32>
    %18 = arith.mulf %17, %17 : vector<8x128xf32>
    %19 = arith.mulf %18, %17 : vector<8x128xf32>
    %cst = arith.constant 2.000000e+00 : f32
    %20 = vector.broadcast %cst : f32 to vector<8x128xf32>
    %21 = arith.mulf %20, %19 : vector<8x128xf32>
    %cst_12 = arith.constant 3.000000e+00 : f32
    %22 = vector.broadcast %cst_12 : f32 to vector<8x128xf32>
    %23 = arith.mulf %22, %18 : vector<8x128xf32>
    %24 = arith.subf %21, %23 : vector<8x128xf32>
    %cst_13 = arith.constant 1.000000e+00 : f32
    %25 = vector.broadcast %cst_13 : f32 to vector<8x128xf32>
    %26 = arith.addf %24, %25 : vector<8x128xf32>
    %27 = vector.broadcast %10 : f32 to vector<8x128xf32>
    %28 = arith.mulf %26, %27 : vector<8x128xf32>
    %cst_14 = arith.constant 2.000000e+00 : f32
    %29 = vector.broadcast %cst_14 : f32 to vector<8x128xf32>
    %30 = arith.mulf %29, %18 : vector<8x128xf32>
    %31 = arith.subf %19, %30 : vector<8x128xf32>
    %32 = arith.addf %31, %17 : vector<8x128xf32>
    %33 = vector.broadcast %11 : f32 to vector<8x128xf32>
    %34 = arith.mulf %32, %33 : vector<8x128xf32>
    %35 = arith.addf %28, %34 : vector<8x128xf32>
    %cst_15 = arith.constant 3.000000e+00 : f32
    %36 = vector.broadcast %cst_15 : f32 to vector<8x128xf32>
    %37 = arith.mulf %36, %18 : vector<8x128xf32>
    %cst_16 = arith.constant 2.000000e+00 : f32
    %38 = vector.broadcast %cst_16 : f32 to vector<8x128xf32>
    %39 = arith.mulf %38, %19 : vector<8x128xf32>
    %40 = arith.subf %37, %39 : vector<8x128xf32>
    %41 = vector.broadcast %12 : f32 to vector<8x128xf32>
    %42 = arith.mulf %40, %41 : vector<8x128xf32>
    %43 = arith.addf %35, %42 : vector<8x128xf32>
    %44 = arith.subf %19, %18 : vector<8x128xf32>
    %45 = vector.broadcast %13 : f32 to vector<8x128xf32>
    %46 = arith.mulf %44, %45 : vector<8x128xf32>
    %47 = arith.addf %43, %46 : vector<8x128xf32>
    %c1_17 = arith.constant 1 : index
    %c0_18 = arith.constant 0 : index
    %48 = memref.load %arg1[%c1_17, %c0_18] : memref<3x8xf32, #tpu.memory_space<smem>>
    %c1_19 = arith.constant 1 : index
    %c1_20 = arith.constant 1 : index
    %49 = memref.load %arg1[%c1_19, %c1_20] : memref<3x8xf32, #tpu.memory_space<smem>>
    %c1_21 = arith.constant 1 : index
    %c2_22 = arith.constant 2 : index
    %50 = memref.load %arg1[%c1_21, %c2_22] : memref<3x8xf32, #tpu.memory_space<smem>>
    %c1_23 = arith.constant 1 : index
    %c3_24 = arith.constant 3 : index
    %51 = memref.load %arg1[%c1_23, %c3_24] : memref<3x8xf32, #tpu.memory_space<smem>>
    %c1_25 = arith.constant 1 : index
    %c4_26 = arith.constant 4 : index
    %52 = memref.load %arg1[%c1_25, %c4_26] : memref<3x8xf32, #tpu.memory_space<smem>>
    %c1_27 = arith.constant 1 : index
    %c5_28 = arith.constant 5 : index
    %53 = memref.load %arg1[%c1_27, %c5_28] : memref<3x8xf32, #tpu.memory_space<smem>>
    %54 = vector.broadcast %48 : f32 to vector<8x128xf32>
    %55 = arith.subf %0, %54 : vector<8x128xf32>
    %56 = vector.broadcast %49 : f32 to vector<8x128xf32>
    %57 = arith.mulf %55, %56 : vector<8x128xf32>
    %58 = arith.mulf %57, %57 : vector<8x128xf32>
    %59 = arith.mulf %58, %57 : vector<8x128xf32>
    %cst_29 = arith.constant 2.000000e+00 : f32
    %60 = vector.broadcast %cst_29 : f32 to vector<8x128xf32>
    %61 = arith.mulf %60, %59 : vector<8x128xf32>
    %cst_30 = arith.constant 3.000000e+00 : f32
    %62 = vector.broadcast %cst_30 : f32 to vector<8x128xf32>
    %63 = arith.mulf %62, %58 : vector<8x128xf32>
    %64 = arith.subf %61, %63 : vector<8x128xf32>
    %cst_31 = arith.constant 1.000000e+00 : f32
    %65 = vector.broadcast %cst_31 : f32 to vector<8x128xf32>
    %66 = arith.addf %64, %65 : vector<8x128xf32>
    %67 = vector.broadcast %50 : f32 to vector<8x128xf32>
    %68 = arith.mulf %66, %67 : vector<8x128xf32>
    %cst_32 = arith.constant 2.000000e+00 : f32
    %69 = vector.broadcast %cst_32 : f32 to vector<8x128xf32>
    %70 = arith.mulf %69, %58 : vector<8x128xf32>
    %71 = arith.subf %59, %70 : vector<8x128xf32>
    %72 = arith.addf %71, %57 : vector<8x128xf32>
    %73 = vector.broadcast %51 : f32 to vector<8x128xf32>
    %74 = arith.mulf %72, %73 : vector<8x128xf32>
    %75 = arith.addf %68, %74 : vector<8x128xf32>
    %cst_33 = arith.constant 3.000000e+00 : f32
    %76 = vector.broadcast %cst_33 : f32 to vector<8x128xf32>
    %77 = arith.mulf %76, %58 : vector<8x128xf32>
    %cst_34 = arith.constant 2.000000e+00 : f32
    %78 = vector.broadcast %cst_34 : f32 to vector<8x128xf32>
    %79 = arith.mulf %78, %59 : vector<8x128xf32>
    %80 = arith.subf %77, %79 : vector<8x128xf32>
    %81 = vector.broadcast %52 : f32 to vector<8x128xf32>
    %82 = arith.mulf %80, %81 : vector<8x128xf32>
    %83 = arith.addf %75, %82 : vector<8x128xf32>
    %84 = arith.subf %59, %58 : vector<8x128xf32>
    %85 = vector.broadcast %53 : f32 to vector<8x128xf32>
    %86 = arith.mulf %84, %85 : vector<8x128xf32>
    %87 = arith.addf %83, %86 : vector<8x128xf32>
    %c1_i32 = arith.constant 1 : i32
    %88 = vector.broadcast %c1_i32 : i32 to vector<8x128xi32>
    %89 = arith.cmpi eq, %7, %88 : vector<8x128xi32>
    %90 = arith.select %89, %87, %47 : vector<8x128xi1>, vector<8x128xf32>
    %c0_35 = arith.constant 0 : index
    %c0_36 = arith.constant 0 : index
    %91 = memref.load %arg1[%c0_35, %c0_36] : memref<3x8xf32, #tpu.memory_space<smem>>
    %c0_37 = arith.constant 0 : index
    %c2_38 = arith.constant 2 : index
    %92 = memref.load %arg1[%c0_37, %c2_38] : memref<3x8xf32, #tpu.memory_space<smem>>
    %c2_39 = arith.constant 2 : index
    %c0_40 = arith.constant 0 : index
    %93 = memref.load %arg1[%c2_39, %c0_40] : memref<3x8xf32, #tpu.memory_space<smem>>
    %c2_41 = arith.constant 2 : index
    %c2_42 = arith.constant 2 : index
    %94 = memref.load %arg1[%c2_41, %c2_42] : memref<3x8xf32, #tpu.memory_space<smem>>
    %95 = vector.broadcast %91 : f32 to vector<8x128xf32>
    %96 = arith.cmpf ole, %0, %95 : vector<8x128xf32>
    %97 = vector.broadcast %93 : f32 to vector<8x128xf32>
    %98 = arith.cmpf oge, %0, %97 : vector<8x128xf32>
    %99 = vector.broadcast %94 : f32 to vector<8x128xf32>
    %100 = arith.select %98, %99, %90 : vector<8x128xi1>, vector<8x128xf32>
    %101 = vector.broadcast %92 : f32 to vector<8x128xf32>
    %102 = arith.select %96, %101, %100 : vector<8x128xi1>, vector<8x128xf32>
    %cst_43 = arith.constant 0.000000e+00 : f32
    %cst_44 = arith.constant 1.000000e+00 : f32
    %103 = vector.broadcast %cst_43 : f32 to vector<8x128xf32>
    %104 = arith.maximumf %103, %102 : vector<8x128xf32>
    %105 = vector.broadcast %cst_44 : f32 to vector<8x128xf32>
    %106 = arith.minimumf %105, %104 : vector<8x128xf32>
    %cst_45 = arith.constant 9.990000e+02 : f32
    %107 = vector.broadcast %cst_45 : f32 to vector<8x128xf32>
    %108 = arith.mulf %106, %107 : vector<8x128xf32>
    %109 = math.floor %108 : vector<8x128xf32>
    %cst_46 = arith.constant 5.000000e-01 : f32
    %110 = vector.broadcast %cst_46 : f32 to vector<8x128xf32>
    %111 = arith.addf %109, %110 : vector<8x128xf32>
    %cst_47 = arith.constant 0.00100100099 : f32
    %112 = vector.broadcast %cst_47 : f32 to vector<8x128xf32>
    %113 = arith.mulf %112, %111 : vector<8x128xf32>
    %cst_48 = arith.constant 1.000000e+00 : f32
    %114 = vector.broadcast %cst_48 : f32 to vector<8x128xf32>
    %115 = arith.minimumf %113, %114 : vector<8x128xf32>
    %116 = arith.subf %1, %0 : vector<8x128xf32>
    %117 = arith.subf %1, %0 : vector<8x128xf32>
    %118 = arith.mulf %116, %117 : vector<8x128xf32>
    %119 = arith.mulf %118, %115 : vector<8x128xf32>
    %cst_49 = arith.constant dense<0.000000e+00> : vector<8xf32>
    %120 = vector.multi_reduction <add>, %119, %cst_49 [1] : vector<8x128xf32> to vector<8xf32>
    %121 = vector.shape_cast %120 : vector<8xf32> to vector<8x1xf32>
    %cst_50 = arith.constant dense<0.000000e+00> : vector<1xf32>
    %122 = vector.multi_reduction <add>, %121, %cst_50 [0] : vector<8x1xf32> to vector<1xf32>
    %123 = vector.shape_cast %122 : vector<1xf32> to vector<1x1xf32>
    %124 = tpu.iota {dimensions = array<i32: 1>} : vector<1x128xi32>
    %c0_i32_51 = arith.constant 0 : i32
    %125 = vector.broadcast %c0_i32_51 : i32 to vector<1x128xi32>
    %126 = arith.cmpi eq, %124, %125 : vector<1x128xi32>
    %cst_52 = arith.constant 0.000000e+00 : f32
    %127 = vector.shape_cast %123 : vector<1x1xf32> to vector<1x1xf32>
    %128 = vector.broadcast %127 : vector<1x1xf32> to vector<1x128xf32>
    %129 = vector.broadcast %cst_52 : f32 to vector<1x128xf32>
    %130 = arith.select %126, %128, %129 : vector<1x128xi1>, vector<1x128xf32>
    %c0_53 = arith.constant 0 : index
    %c0_54 = arith.constant 0 : index
    %131 = vector.load %arg4[%c0_53, %c0_54] : memref<1x128xf32, #tpu.memory_space<vmem>>, vector<1x128xf32>
    tpu.vector_store %arg4[%c0_53, %c0_54], %130 {strides = array<i32>} : memref<1x128xf32, #tpu.memory_space<vmem>>, vector<1x128xf32>,
    return
  }
  func.func @transform_0(%arg0: i32) -> (i32, i32) {
    %c0_i32 = arith.constant 0 : i32
    %c0_i32_0 = arith.constant 0 : i32
    %c0_i32_1 = arith.constant 0 : i32
    return %c0_i32, %c0_i32_0 : i32, i32
  }
  func.func @transform_1(%arg0: i32) -> (i32, i32) {
    %c0_i32 = arith.constant 0 : i32
    %c0_i32_0 = arith.constant 0 : i32
    return %arg0, %c0_i32 : i32, i32
  }
  func.func @transform_2(%arg0: i32) -> (i32, i32) {
    %c0_i32 = arith.constant 0 : i32
    %c0_i32_0 = arith.constant 0 : i32
    return %arg0, %c0_i32 : i32, i32
  }
  func.func @transform_3(%arg0: i32) -> (i32, i32) {
    %c0_i32 = arith.constant 0 : i32
    %c0_i32_0 = arith.constant 0 : i32
    return %arg0, %c0_i32 : i32, i32
  }
}

</mosaic_0001>

<bundles_post_ra>
// kernel: sera_criterion.1
= control target key start
LH: loop header
LB: loop body
LE: loop exit
PB: predicated region body
PF: predicated region fallthrough
CT: control target
= control target key end

     0   :  { %8 = vsyncpa [#allocation3], 0  ;;  %s237_s0 = inlined_call_operand.vmem [shape: f32[3,8], index: 0, kind: input, shape index: {}]   ;;  %s238_s1 = inlined_call_operand.vmem [shape: f32[8,128], index: 1, kind: input, shape index: {}]   ;;  %s239_s2 = inlined_call_operand.vmem [shape: f32[8,128], index: 2, kind: input, shape index: {}]   ;;  %s240_s3 = inlined_call_operand.vmem [shape: f32[1,128], index: 3, kind: output, shape index: {}]  }
   0x1   :  { %s15_s14 = sshll.u32 %s237_s0, 4  ;;  %s16_s14 = int_to_ptr.vmem [resolvable:$true] %s15_s14 }
   0x2   :  { %s147_s15 = scalar_lea.vmem %s16_s14, 64  ;;  %p152_p1 = scmp.lt.s32.totalorder %s16_s14, %s16_s14 }
   0x3   :  { %p148_p0 = scmp.ne.s32.totalorder %s16_s14, %s147_s15  ;;  %p153_p2 = scmp.lt.s32.totalorder %s147_s15, %s147_s15 }
   0x5   :  { %p154_p3 = por %p153_p2, %p152_p1 }
   0x7   :  { %p155_p4 = pnand %p154_p3, %p148_p0 }
   0x9   :  { %158 = shalt.err (!%p155_p4)
}
   0xa   :  { %s161_s16 = smov [#allocation2]  }
   0xb   :  { %18 = dma.vmem_to_smem %s16_s14, 64, %s161_s16, [#allocation3]  }
   0xc   :  { %159 = dma.done.wait [#allocation3], 64  }
   0xd   :  { %160 = vsyncadd [#allocation3], 4294967232 }
   0xe   :  { %26 = sfence }
   0xf   :  { %s185_s17 = sld [smem:[#allocation2 + $0x80]]  ;;  %v192_v0 = vld [vmem:[%s238_s1] sm:$0xff] }
  0x10   :  { %s187_s18 = sld [smem:[#allocation2]]  ;;  %v28_v60 = vld [vmem:[%s239_s2] sm:$0xff] }
  0x11   :  { %s134_s0 = sld [smem:[#allocation2 + $0x1]]  ;;  %v112_v63 = vsub.f32 %v28_v60, %v192_v0 }
  0x12   :  { %s139_s21 = sld [smem:[#allocation2 + $0x81]] }
  0x13   :  { %s136_s22 = sld [smem:[#allocation2 + $0x3]] }
  0x14   :  { %s199_s23 = sld [smem:[#allocation2 + $0x2]] }
  0x15   :  { %v30_v1 = vstv %s185_s17  ;;  %s204_s24 = sld [smem:[#allocation2 + $0x4]] }
  0x16   :  { %v39_v2 = vstv %s187_s18  ;;  %v70_v6 = vsub.f32 %v192_v0, %v30_v1  ;;  %s206_s1 = sld [smem:[#allocation2 + $0x5]]  ;;  %vm31_vm0 = vcmp.ge.f32.partialorder %v192_v0, %v30_v1 }
  0x17   :  { %v40_v3 = vsub.f32 %v192_v0, %v39_v2  ;;  %v41_v4 = vstv %s134_s0  ;;  %s208_s25 = sld [smem:[#allocation2 + $0x83]]  ;;  %vm99_vm2 = vcmp.le.f32.partialorder %v192_v0, %v39_v2 }
  0x18   :  { %v71_v8 = vstv %s139_s21  ;;  %s210_s26 = sld [smem:[#allocation2 + $0x82]] }
  0x19   :  { %v42_v5 = vmul.f32 %v41_v4, %v40_v3  ;;  %v72_v12 = vmul.f32 %v71_v8, %v70_v6  ;;  %s212_s27 = sld [smem:[#allocation2 + $0x84]]  ;;  %v54_v16 = vstv %s136_s22  ;;  %v113_v4 = vmul.f32 %v112_v63, %v112_v63 }
  0x1a   :  { %v49_v18 = vstv %s199_s23  ;;  %s215_s28 = sld [smem:[#allocation2 + $0x85]]  ;;  %v123_v8 = vlaneseq }
  0x1b   :  { %v43_v7 = vmul.f32 %v42_v5, %v42_v5  ;;  %v73_v15 = vmul.f32 %v72_v12, %v72_v12  ;;  %v58_v26 = vstv %s204_s24  ;;  %s144_s29 = sld [smem:[#allocation2 + $0x100]] }
  0x1c   :  { %v62_v37 = vstv %s206_s1  ;;  %s145_s30 = sld [smem:[#allocation2 + $0x102]] }
  0x1d   :  { %v44_v9 = vmul.f32 %v43_v7, %v42_v5  ;;  %v46_v10 = vmul.f32 3.0, %v43_v7  ;;  %v51_v11 = vmul.f32 2.0, %v43_v7  ;;  %v74_v21 = vmul.f32 %v73_v15, %v72_v12 }
  0x1e   :  { %v76_v22 = vmul.f32 3.0, %v73_v15  ;;  %v81_v23 = vmul.f32 2.0, %v73_v15  ;;  %v84_v31 = vstv %s208_s25  ;;  %v79_v38 = vstv %s210_s26 }
  0x1f   :  { %v45_v13 = vmul.f32 2.0, %v44_v9  ;;  %v52_v14 = vsub.f32 %v44_v9, %v51_v11  ;;  %v75_v27 = vmul.f32 2.0, %v74_v21  ;;  %v61_v30 = vsub.f32 %v44_v9, %v43_v7 }
  0x20   :  { %v82_v28 = vsub.f32 %v74_v21, %v81_v23  ;;  %v88_v39 = vstv %s212_s27  ;;  %v91_v42 = vsub.f32 %v74_v21, %v73_v15  ;;  %v92_v43 = vstv %s215_s28 }
  0x21   :  { %v47_v17 = vsub.f32 %v45_v13, %v46_v10  ;;  %v53_v19 = vadd.f32 %v52_v14, %v42_v5  ;;  %v57_v20 = vsub.f32 %v46_v10, %v45_v13  ;;  %v77_v33 = vsub.f32 %v75_v27, %v76_v22 }
  0x22   :  { %v83_v34 = vadd.f32 %v82_v28, %v72_v12  ;;  %v87_v35 = vsub.f32 %v76_v22, %v75_v27  ;;  %v63_v45 = vmul.f32 %v62_v37, %v61_v30  ;;  %v93_v49 = vmul.f32 %v92_v43, %v91_v42 }
  0x23   :  { %v48_v24 = vadd.f32 1.0, %v47_v17  ;;  %v55_v25 = vmul.f32 %v54_v16, %v53_v19  ;;  %v59_v32 = vmul.f32 %v58_v26, %v57_v20  ;;  %v78_v40 = vadd.f32 1.0, %v77_v33 }
  0x24   :  { %v85_v41 = vmul.f32 %v84_v31, %v83_v34  ;;  %v89_v47 = vmul.f32 %v88_v39, %v87_v35  ;;  %v100_v50 = vstv %s144_s29  ;;  %v102_v54 = vstv %s145_s30 }
  0x25   :  { %v50_v29 = vmul.f32 %v49_v18, %v48_v24  ;;  %v80_v46 = vmul.f32 %v79_v38, %v78_v40  ;;  %vm101_vm1 = vcmp.ge.f32.partialorder %v192_v0, %v100_v50  ;;  %v124_v11 = vand.u32 127, %v123_v8 }
  0x27   :  { %v56_v36 = vadd.f32 %v55_v25, %v50_v29  ;;  %v86_v48 = vadd.f32 %v85_v41, %v80_v46  ;;  %vm125_vm3 = vcmp.eq.s32.totalorder %v124_v11, 0 }
  0x29   :  { %v60_v44 = vadd.f32 %v59_v32, %v56_v36  ;;  %v90_v52 = vadd.f32 %v89_v47, %v86_v48 }
  0x2b   :  { %v64_v51 = vadd.f32 %v63_v45, %v60_v44  ;;  %v94_v53 = vadd.f32 %v93_v49, %v90_v52 }
  0x2d   :  { %v96_v55 = vsel %vm31_vm0, %v94_v53, %v64_v51 }
  0x2e   :  { %v103_v56 = vsel %vm101_vm1, %v102_v54, %v96_v55 }
  0x2f   :  { %v104_v57 = vsel %vm99_vm2, %v49_v18, %v103_v56 }
  0x30   :  { %v105_v58 = vmax.f32 %v104_v57, 0.0 }
  0x32   :  { %v106_v59 = vmin.f32 %v105_v58, 1.0 }
  0x34   :  { %v107_v61 = vmul.f32 999.0, %v106_v59 }
  0x36   :  { %v108_v62 = vfloor.f32 %v107_v61 }
  0x38   :  { %v109_v1 = vadd.f32 0.5, %v108_v62 }
  0x3a   :  { %v110_v3 = vmul.f32 0.001001001, %v109_v1 }
  0x3c   :  { %v111_v5 = vmin.f32 %v110_v3, 1.0 }
  0x3e   :  { %v114_v6 = vmul.f32 %v113_v4, %v111_v5 }
  0x40   :  { %115 = vadd.xlane.f32.xlu0 %v114_v6 }
  0xc9   :  { %v116_v2 = vpop.xlane.xlu0 %115 }
  0xca   :  { %v117_v7 = vrot.slane %v116_v2, 4 }
  0xcc   :  { %v118_v9 = vadd.f32 %v117_v7, %v116_v2 }
  0xce   :  { %v119_v10 = vrot.slane %v118_v9, 2 }
  0xd0   :  { %v120_v12 = vadd.f32 %v119_v10, %v118_v9 }
  0xd2   :  { %v121_v13 = vrot.slane %v120_v12, 1 }
  0xd4   :  { %v122_v14 = vadd.f32 %v121_v13, %v120_v12 }
  0xd6   :  { %v126_v15 = vsel %vm125_vm3, %v122_v14, 0.0 }
  0xd7   :  { %127 = vst [vmem:[%s240_s3] sm:$0x1] %v126_v15 }
  0xd8   :  { %132 = vsyncpa [#allocation3], 1 }

</bundles_post_ra>
